<compile_context>
chip_gen: v7x
topology: tpu7x:2x2x1
jax: 0.10.0
libtpu: 0.0.40
codegen_flags: <defaults>
</compile_context>

<pallas_src>
import functools
import math

import jax
import jax.numpy as jnp
from jax import lax
from jax.experimental import pallas as pl
from jax.experimental.pallas import tpu as pltpu


def _loss_kernel(pred_ref, true_ref, w_ref, out_ref, *, n, scale_log2):
    pred = pred_ref[...].astype(jnp.float32)
    true = true_ref[...].astype(jnp.float32)

    eps = jnp.float32(1e-8)

    # --- supervised BCE + sparsity: reduce FIRST so pred/true/bce temporaries
    # die before the expm chain is built (lower peak VMEM liveness). ---------
    bce = (-true * jnp.log(pred + eps)
           - (1.0 - true) * jnp.log(1.0 - pred + eps))
    supervised_loss = jnp.sum(bce) * jnp.float32(1.0 / (n * n))
    sparsity_loss = jnp.sum(jnp.abs(pred)) * w_ref[0]

    # --- acyclicity: trace(expm(W*W)) - n ------------------------------------
    w_sq = pred * pred

    rows = lax.broadcasted_iota(jnp.int32, (n, n), 0)
    cols = lax.broadcasted_iota(jnp.int32, (n, n), 1)
    eye = (rows == cols).astype(jnp.float32)

    # scale: expm(A) = expm(A / 2^s)^(2^s), scaled norm <= 0.5
    a = w_sq * jnp.float32(1.0 / (2.0 ** scale_log2))

    def mm(x, y):
        return jnp.dot(x, y, preferred_element_type=jnp.float32)

    # degree-8 Taylor polynomial via Paterson-Stockmeyer:
    #   exp(a) ~= q0(a) + a^4 @ q1(a)
    #   q0 = c0 I + c1 a + c2 a^2 + c3 a^3
    #   q1 = c4 I + c5 a + c6 a^2 + c7 a^3 + c8 a^4
    # a^3 and a^4 come out of ONE fused matmul (RHS widened along lanes).
    a2 = mm(a, a)
    a34 = mm(a2, jnp.concatenate([a, a2], axis=-1))   # (n, 2n): [a^3 | a^4]
    a3 = a34[:, :n]
    a4 = a34[:, n:]

    c = [1.0 / math.factorial(k) for k in range(9)]
    q0 = (eye * jnp.float32(c[0]) + a * jnp.float32(c[1])
          + a2 * jnp.float32(c[2]) + a3 * jnp.float32(c[3]))
    q1 = (eye * jnp.float32(c[4]) + a * jnp.float32(c[5])
          + a2 * jnp.float32(c[6]) + a3 * jnp.float32(c[7])
          + a4 * jnp.float32(c[8]))
    exp_a = q0 + mm(a4, q1)

    # undo the scaling: (s - 1) explicit squarings ...
    m = exp_a
    for _ in range(scale_log2 - 1):          # scale_log2 >= 1 always
        m = mm(m, m)

    # ... and fold the final squaring into the trace:
    #   trace(M @ M) - n == sum(M * M.T - I)
    acyc_raw = jnp.sum(m * m.T - eye)
    acyclicity_loss = acyc_raw * w_ref[1]

    total = supervised_loss + sparsity_loss + acyclicity_loss

    out_ref[0] = total
    out_ref[1] = supervised_loss
    out_ref[2] = sparsity_loss
    out_ref[3] = acyclicity_loss


def _vmem_capacity_bytes():
    """Per-TensorCore VMEM capacity, with a conservative (v7x) fallback."""
    try:
        return int(pltpu.get_tpu_info().vmem_capacity_bytes)
    except Exception:
        return 64 * 1024 * 1024


def graph_structure_loss(pred_edges, true_edges,
                         sparsity_weight=0.1, acyclicity_weight=1.0):
    """Pallas implementation of GraphStructureLoss.forward."""
    n = pred_edges.shape[0]
    assert pred_edges.shape == (n, n) and true_edges.shape == (n, n)
    # TODO(synk): tile the expm matmuls for n > 1024 instead of asserting.
    assert n <= 1024, "monolithic VMEM kernel is capped at n <= 1024"

    # pred entries are probabilities in [0,1] -> ||W*W||_inf <= n.  Scale so
    # the scaled norm is <= 0.5; degree-8 Taylor truncation is then
    # ~0.5^9/9! ~ 5e-9 relative, << the test tolerance after amplification.
    scale_log2 = (max(0, math.ceil(math.log2(n))) if n > 1 else 0) + 1

    kernel = functools.partial(_loss_kernel, n=n, scale_log2=scale_log2)

    # MXU chain: a2 (2n^3) + fused a3/a4 (4n^3) + a4@q1 (2n^3) + squarings.
    num_square = scale_log2 - 1
    cost = pl.CostEstimate(
        flops=(8 + 2 * num_square) * n * n * n + 30 * n * n,
        transcendentals=2 * n * n,                      # the two logs of the BCE
        bytes_accessed=(pred_edges.size * pred_edges.dtype.itemsize
                        + true_edges.size * true_edges.dtype.itemsize + 8 + 16))

    # Peak live set is ~6-7 (n, n) f32 temporaries.  Only force a VMEM budget
    # when that could exceed the smallest default scoped limit (v5e: 16 MiB),
    # and clamp the request below the physical per-core VMEM (v7x: 64 MiB).
    live_vmem_bytes = 7 * 4 * n * n
    compiler_params = None
    if live_vmem_bytes > 12 * 1024 * 1024:
        cap = _vmem_capacity_bytes()
        compiler_params = pltpu.CompilerParams(
            vmem_limit_bytes=min(live_vmem_bytes + (4 << 20), (cap * 3) // 4))

    weights = jnp.array([sparsity_weight, acyclicity_weight], dtype=jnp.float32)

    # Inputs are passed in their native dtype (no wrapper-side upcast); the
    # kernel casts after the load.  Weights ride in SMEM so sweeping them does
    # not trigger a recompile.
    out = pl.pallas_call(
        kernel,
        out_shape=jax.ShapeDtypeStruct((4,), jnp.float32),
        in_specs=[pl.BlockSpec(memory_space=pltpu.MemorySpace.VMEM),
                  pl.BlockSpec(memory_space=pltpu.MemorySpace.VMEM),
                  pl.BlockSpec(memory_space=pltpu.MemorySpace.SMEM)],
        out_specs=pl.BlockSpec(memory_space=pltpu.MemorySpace.SMEM),
        cost_estimate=cost,
        compiler_params=compiler_params,
    )(pred_edges, true_edges, weights)

    total = out[0]
    loss_components = {
        'supervised_loss': out[1],
        'sparsity_loss': out[2],
        'acyclicity_loss': out[3],
    }
    return total, loss_components


def _reference(pred, true, sparsity_weight=0.1, acyclicity_weight=1.0):
    """Pure-JAX reference mirroring the PyTorch forward."""
    eps = 1e-8
    bce = -true * jnp.log(pred + eps) - (1 - true) * jnp.log(1 - pred + eps)
    supervised = jnp.mean(bce)
    sparsity = jnp.sum(jnp.abs(pred)) * sparsity_weight
    n = pred.shape[0]
    exp_w = jax.scipy.linalg.expm(pred * pred)
    acyclicity = (jnp.trace(exp_w) - n) * acyclicity_weight
    return supervised + sparsity + acyclicity, supervised, sparsity, acyclicity


if __name__ == "__main__":
    key = jax.random.PRNGKey(0)
    k1, k2 = jax.random.split(key)

    n = 16  # number of graph nodes
    # predicted edge probabilities in (0, 1)
    pred_edges = jax.nn.sigmoid(jax.random.normal(k1, (n, n), dtype=jnp.float32))
    # ground-truth adjacency (binary)
    true_edges = (jax.random.uniform(k2, (n, n)) < 0.2).astype(jnp.float32)

    total, comps = graph_structure_loss(pred_edges, true_edges)
    total = jax.block_until_ready(total)

    ref_total, ref_sup, ref_sp, ref_ac = _reference(pred_edges, true_edges)
    import numpy as np
    np.testing.assert_allclose(np.asarray(total), np.asarray(ref_total),
                               rtol=5e-3, atol=5e-3)
    np.testing.assert_allclose(np.asarray(comps['supervised_loss']),
                               np.asarray(ref_sup), rtol=5e-3, atol=5e-3)
    np.testing.assert_allclose(np.asarray(comps['sparsity_loss']),
                               np.asarray(ref_sp), rtol=5e-3, atol=5e-3)
    np.testing.assert_allclose(np.asarray(comps['acyclicity_loss']),
                               np.asarray(ref_ac), rtol=5e-3, atol=5e-3)

    print("KERNEL_OK")
</pallas_src>

<mosaic_0001>
module attributes {stable_mosaic.version = 11 : i64} {
  func.func @_loss_kernel(%arg0: memref<16x16xf32, #tpu.memory_space<vmem>>, %arg1: memref<16x16xf32, #tpu.memory_space<vmem>>, %arg2: memref<2xf32, #tpu.memory_space<smem>>, %arg3: memref<4xf32, #tpu.memory_space<smem>>) attributes {dimension_semantics = [], scalar_prefetch = 0 : i64, scratch_operands = 0 : i64, tpu.core_type = #tpu.core_type<tc>} {
    %c0 = arith.constant 0 : index
    %c0_0 = arith.constant 0 : index
    %0 = vector.load %arg0[%c0, %c0_0] : memref<16x16xf32, #tpu.memory_space<vmem>>, vector<16x16xf32>
    %c0_1 = arith.constant 0 : index
    %c0_2 = arith.constant 0 : index
    %1 = vector.load %arg1[%c0_1, %c0_2] : memref<16x16xf32, #tpu.memory_space<vmem>>, vector<16x16xf32>
    %cst = arith.constant 0.000000e+00 : f32
    %2 = vector.broadcast %cst : f32 to vector<16x16xf32>
    %3 = arith.subf %2, %1 : vector<16x16xf32>
    %cst_3 = arith.constant 9.99999993E-9 : f32
    %4 = vector.broadcast %cst_3 : f32 to vector<16x16xf32>
    %5 = arith.addf %0, %4 : vector<16x16xf32>
    %6 = math.log %5 : vector<16x16xf32>
    %7 = arith.mulf %3, %6 : vector<16x16xf32>
    %cst_4 = arith.constant 1.000000e+00 : f32
    %8 = vector.broadcast %cst_4 : f32 to vector<16x16xf32>
    %9 = arith.subf %8, %1 : vector<16x16xf32>
    %cst_5 = arith.constant 1.000000e+00 : f32
    %10 = vector.broadcast %cst_5 : f32 to vector<16x16xf32>
    %11 = arith.subf %10, %0 : vector<16x16xf32>
    %cst_6 = arith.constant 9.99999993E-9 : f32
    %12 = vector.broadcast %cst_6 : f32 to vector<16x16xf32>
    %13 = arith.addf %11, %12 : vector<16x16xf32>
    %14 = math.log %13 : vector<16x16xf32>
    %15 = arith.mulf %9, %14 : vector<16x16xf32>
    %16 = arith.subf %7, %15 : vector<16x16xf32>
    %17 = vector.shape_cast %16 : vector<16x16xf32> to vector<1x16x16xf32>
    %cst_7 = arith.constant dense<0.000000e+00> : vector<1xf32>
    %18 = vector.multi_reduction <add>, %17, %cst_7 [1, 2] : vector<1x16x16xf32> to vector<1xf32>
    %19 = vector.shape_cast %18 : vector<1xf32> to vector<1x1x1xf32>
    %20 = vector.extract %19[0, 0, 0] : f32 from vector<1x1x1xf32>
    %cst_8 = arith.constant 3.906250e-03 : f32
    %21 = arith.mulf %20, %cst_8 : f32
    %22 = math.absf %0 : vector<16x16xf32>
    %23 = vector.shape_cast %22 : vector<16x16xf32> to vector<1x16x16xf32>
    %cst_9 = arith.constant dense<0.000000e+00> : vector<1xf32>
    %24 = vector.multi_reduction <add>, %23, %cst_9 [1, 2] : vector<1x16x16xf32> to vector<1xf32>
    %25 = vector.shape_cast %24 : vector<1xf32> to vector<1x1x1xf32>
    %26 = vector.extract %25[0, 0, 0] : f32 from vector<1x1x1xf32>
    %c0_10 = arith.constant 0 : index
    %27 = memref.load %arg2[%c0_10] : memref<2xf32, #tpu.memory_space<smem>>
    %28 = arith.mulf %26, %27 : f32
    %29 = arith.mulf %0, %0 : vector<16x16xf32>
    %30 = tpu.iota {dimensions = array<i32: 0>} : vector<16x16xi32>
    %31 = tpu.iota {dimensions = array<i32: 1>} : vector<16x16xi32>
    %32 = arith.cmpi eq, %30, %31 : vector<16x16xi32>
    %33 = arith.extui %32 : vector<16x16xi1> to vector<16x16xi32>
    %34 = arith.sitofp %33 : vector<16x16xi32> to vector<16x16xf32>
    %cst_11 = arith.constant 3.125000e-02 : f32
    %35 = vector.broadcast %cst_11 : f32 to vector<16x16xf32>
    %36 = arith.mulf %29, %35 : vector<16x16xf32>
    %cst_12 = arith.constant dense<0.000000e+00> : vector<16x16xf32>
    %37 = tpu.matmul %36, %36, %cst_12 {dimension_numbers = #tpu.dot_dimension_numbers<[1], [0], [0], [1], [0, 0, 1, 1], [], []>} : vector<16x16xf32>, vector<16x16xf32>, vector<16x16xf32> -> vector<16x16xf32>
    %38 = tpu.concatenate %36, %37 in 1 : vector<16x16xf32>, vector<16x16xf32> -> vector<16x32xf32>
    %cst_13 = arith.constant dense<0.000000e+00> : vector<16x32xf32>
    %39 = tpu.matmul %37, %38, %cst_13 {dimension_numbers = #tpu.dot_dimension_numbers<[1], [0], [0], [1], [0, 0, 1, 1], [], []>} : vector<16x16xf32>, vector<16x32xf32>, vector<16x32xf32> -> vector<16x32xf32>
    %40 = vector.extract_strided_slice %39 {offsets = [0, 0], sizes = [16, 16], strides = [1, 1]} : vector<16x32xf32> to vector<16x16xf32>
    %41 = vector.extract_strided_slice %39 {offsets = [0, 16], sizes = [16, 16], strides = [1, 1]} : vector<16x32xf32> to vector<16x16xf32>
    %cst_14 = arith.constant 1.000000e+00 : f32
    %42 = vector.broadcast %cst_14 : f32 to vector<16x16xf32>
    %43 = arith.mulf %34, %42 : vector<16x16xf32>
    %cst_15 = arith.constant 1.000000e+00 : f32
    %44 = vector.broadcast %cst_15 : f32 to vector<16x16xf32>
    %45 = arith.mulf %36, %44 : vector<16x16xf32>
    %46 = arith.addf %43, %45 : vector<16x16xf32>
    %cst_16 = arith.constant 5.000000e-01 : f32
    %47 = vector.broadcast %cst_16 : f32 to vector<16x16xf32>
    %48 = arith.mulf %37, %47 : vector<16x16xf32>
    %49 = arith.addf %46, %48 : vector<16x16xf32>
    %cst_17 = arith.constant 0.166666672 : f32
    %50 = vector.broadcast %cst_17 : f32 to vector<16x16xf32>
    %51 = arith.mulf %40, %50 : vector<16x16xf32>
    %52 = arith.addf %49, %51 : vector<16x16xf32>
    %cst_18 = arith.constant 0.0416666679 : f32
    %53 = vector.broadcast %cst_18 : f32 to vector<16x16xf32>
    %54 = arith.mulf %34, %53 : vector<16x16xf32>
    %cst_19 = arith.constant 0.00833333377 : f32
    %55 = vector.broadcast %cst_19 : f32 to vector<16x16xf32>
    %56 = arith.mulf %36, %55 : vector<16x16xf32>
    %57 = arith.addf %54, %56 : vector<16x16xf32>
    %cst_20 = arith.constant 0.00138888892 : f32
    %58 = vector.broadcast %cst_20 : f32 to vector<16x16xf32>
    %59 = arith.mulf %37, %58 : vector<16x16xf32>
    %60 = arith.addf %57, %59 : vector<16x16xf32>
    %cst_21 = arith.constant 1.98412701E-4 : f32
    %61 = vector.broadcast %cst_21 : f32 to vector<16x16xf32>
    %62 = arith.mulf %40, %61 : vector<16x16xf32>
    %63 = arith.addf %60, %62 : vector<16x16xf32>
    %cst_22 = arith.constant 2.48015876E-5 : f32
    %64 = vector.broadcast %cst_22 : f32 to vector<16x16xf32>
    %65 = arith.mulf %41, %64 : vector<16x16xf32>
    %66 = arith.addf %63, %65 : vector<16x16xf32>
    %cst_23 = arith.constant dense<0.000000e+00> : vector<16x16xf32>
    %67 = tpu.matmul %41, %66, %cst_23 {dimension_numbers = #tpu.dot_dimension_numbers<[1], [0], [0], [1], [0, 0, 1, 1], [], []>} : vector<16x16xf32>, vector<16x16xf32>, vector<16x16xf32> -> vector<16x16xf32>
    %68 = arith.addf %52, %67 : vector<16x16xf32>
    %cst_24 = arith.constant dense<0.000000e+00> : vector<16x16xf32>
    %69 = tpu.matmul %68, %68, %cst_24 {dimension_numbers = #tpu.dot_dimension_numbers<[1], [0], [0], [1], [0, 0, 1, 1], [], []>} : vector<16x16xf32>, vector<16x16xf32>, vector<16x16xf32> -> vector<16x16xf32>
    %cst_25 = arith.constant dense<0.000000e+00> : vector<16x16xf32>
    %70 = tpu.matmul %69, %69, %cst_25 {dimension_numbers = #tpu.dot_dimension_numbers<[1], [0], [0], [1], [0, 0, 1, 1], [], []>} : vector<16x16xf32>, vector<16x16xf32>, vector<16x16xf32> -> vector<16x16xf32>
    %cst_26 = arith.constant dense<0.000000e+00> : vector<16x16xf32>
    %71 = tpu.matmul %70, %70, %cst_26 {dimension_numbers = #tpu.dot_dimension_numbers<[1], [0], [0], [1], [0, 0, 1, 1], [], []>} : vector<16x16xf32>, vector<16x16xf32>, vector<16x16xf32> -> vector<16x16xf32>
    %cst_27 = arith.constant dense<0.000000e+00> : vector<16x16xf32>
    %72 = tpu.matmul %71, %71, %cst_27 {dimension_numbers = #tpu.dot_dimension_numbers<[1], [0], [0], [1], [0, 0, 1, 1], [], []>} : vector<16x16xf32>, vector<16x16xf32>, vector<16x16xf32> -> vector<16x16xf32>
    %73 = tpu.transpose %72, [1, 0] : vector<16x16xf32> -> vector<16x16xf32>
    %74 = arith.mulf %72, %73 : vector<16x16xf32>
    %75 = arith.subf %74, %34 : vector<16x16xf32>
    %76 = vector.shape_cast %75 : vector<16x16xf32> to vector<1x16x16xf32>
    %cst_28 = arith.constant dense<0.000000e+00> : vector<1xf32>
    %77 = vector.multi_reduction <add>, %76, %cst_28 [1, 2] : vector<1x16x16xf32> to vector<1xf32>
    %78 = vector.shape_cast %77 : vector<1xf32> to vector<1x1x1xf32>
    %79 = vector.extract %78[0, 0, 0] : f32 from vector<1x1x1xf32>
    %c1 = arith.constant 1 : index
    %80 = memref.load %arg2[%c1] : memref<2xf32, #tpu.memory_space<smem>>
    %81 = arith.mulf %79, %80 : f32
    %82 = arith.addf %21, %28 : f32
    %83 = arith.addf %82, %81 : f32
    %c0_29 = arith.constant 0 : index
    %84 = memref.load %arg3[%c0_29] : memref<4xf32, #tpu.memory_space<smem>>
    memref.store %83, %arg3[%c0_29] : memref<4xf32, #tpu.memory_space<smem>>
    %c1_30 = arith.constant 1 : index
    %85 = memref.load %arg3[%c1_30] : memref<4xf32, #tpu.memory_space<smem>>
    memref.store %21, %arg3[%c1_30] : memref<4xf32, #tpu.memory_space<smem>>
    %c2 = arith.constant 2 : index
    %86 = memref.load %arg3[%c2] : memref<4xf32, #tpu.memory_space<smem>>
    memref.store %28, %arg3[%c2] : memref<4xf32, #tpu.memory_space<smem>>
    %c3 = arith.constant 3 : index
    %87 = memref.load %arg3[%c3] : memref<4xf32, #tpu.memory_space<smem>>
    memref.store %81, %arg3[%c3] : memref<4xf32, #tpu.memory_space<smem>>
    return
  }
}

</mosaic_0001>

<bundles_post_ra>
// kernel: tpu_custom_call.1
= control target key start
LH: loop header
LB: loop body
LE: loop exit
PB: predicated region body
PF: predicated region fallthrough
CT: control target
= control target key end

     0   :  { %8 = vsyncpa [#allocation3], 0  ;;  %s1160_s0 = inlined_call_operand.hbm [shape: f32[16,16], index: 0, kind: input, shape index: {}]   ;;  %s1161_s1 = inlined_call_operand.hbm [shape: f32[16,16], index: 1, kind: input, shape index: {}]   ;;  %s1162_s2 = inlined_call_operand.vmem [shape: f32[2], index: 2, kind: input, shape index: {}]   ;;  %s1163_s3 = inlined_call_operand.hbm [shape: f32[4], index: 3, kind: output, shape index: {}]  }
   0x1   :  { %9 = vsyncpa [#allocation7], 0 }
   0x2   :  { %10 = vsyncpa [#allocation5], 0 }
   0x3   :  { %11 = vsyncpa [#allocation4], 0  ;;  %s1046_s12 = smov [#allocation2]   ;;  %s972_s16 = scalar_lea.hbm %s1160_s0, 256 }
   0x4   :  { %s17_s13 = sshll.u32 %s1046_s12, 4  ;;  %p973_p0 = scmp.ne.s32.totalorder %s1160_s0, %s972_s16  ;;  %s18_s13 = int_to_ptr.vmem [resolvable:$true] %s17_s13 }
   0x5   :  { %p976_p1 = scmp.lt.u32.totalorder %s972_s16, %s1160_s0 }
   0x7   :  { %p978_p2 = pnand %p976_p1, %p973_p0 }
   0x9   :  { %981 = shalt.err (!%p978_p2)
}
   0xa   :  { %s982_s21 = scalar_lea.vmem %s18_s13, 256  ;;  %p987_p4 = scmp.lt.s32.totalorder %s18_s13, %s18_s13 }
   0xb   :  { %p983_p3 = scmp.ne.s32.totalorder %s18_s13, %s982_s21  ;;  %p988_p5 = scmp.lt.s32.totalorder %s982_s21, %s982_s21 }
   0xd   :  { %p989_p6 = por %p988_p5, %p987_p4 }
   0xf   :  { %p990_p7 = pnand %p989_p6, %p983_p3 }
  0x11   :  { %993 = shalt.err (!%p990_p7)
}
  0x12   :  { %s1047_s22 = smov 128   ;;  %s1048_s23 = smov 8  }
  0x13   :  { %23 = dma.hbm_to_vmem [thread:$0]  %s1160_s0, 256, %s18_s13, [#allocation3], %s1047_s22, %s1047_s22, %s1048_s23  }
  0x14   :  { %s1049_s26 = smov [#allocation6]   ;;  %s42_s30 = sshll.u32 %s1162_s2, 4  ;;  %s43_s30 = int_to_ptr.vmem [resolvable:$true] %s42_s30 }
  0x15   :  { %s29_s27 = sshll.u32 %s1049_s26, 4  ;;  %s994_s6 = scalar_lea.hbm %s1161_s1, 256  ;;  %s30_s27 = int_to_ptr.vmem [resolvable:$true] %s29_s27 }
  0x16   :  { %p995_p8 = scmp.ne.s32.totalorder %s1161_s1, %s994_s6  ;;  %p998_p9 = scmp.lt.u32.totalorder %s994_s6, %s1161_s1 }
  0x18   :  { %p1000_p10 = pnand %p998_p9, %p995_p8 }
  0x1a   :  { %1003 = shalt.err (!%p1000_p10)
}
  0x1b   :  { %s1004_s0 = scalar_lea.vmem %s30_s27, 256  ;;  %p1009_p12 = scmp.lt.s32.totalorder %s30_s27, %s30_s27 }
  0x1c   :  { %p1005_p11 = scmp.ne.s32.totalorder %s30_s27, %s1004_s0  ;;  %p1010_p13 = scmp.lt.s32.totalorder %s1004_s0, %s1004_s0 }
  0x1e   :  { %p1011_p0 = por %p1010_p13, %p1009_p12 }
  0x20   :  { %p1012_p1 = pnand %p1011_p0, %p1005_p11 }
  0x22   :  { %1015 = shalt.err (!%p1012_p1)
}
  0x23   :  { %35 = dma.hbm_to_vmem [thread:$0]  %s1161_s1, 256, %s30_s27, [#allocation7], %s1047_s22, %s1047_s22, %s1048_s23  }
  0x24   :  { %s1016_s12 = scalar_lea.vmem %s43_s30, 16  ;;  %p1021_p3 = scmp.lt.s32.totalorder %s43_s30, %s43_s30 }
  0x25   :  { %p1017_p2 = scmp.ne.s32.totalorder %s43_s30, %s1016_s12  ;;  %p1022_p4 = scmp.lt.s32.totalorder %s1016_s12, %s1016_s12 }
  0x27   :  { %p1023_p5 = por %p1022_p4, %p1021_p3 }
  0x29   :  { %p1024_p6 = pnand %p1023_p5, %p1017_p2 }
  0x2b   :  { %1027 = shalt.err (!%p1024_p6)
}
  0x2c   :  { %s1050_s13 = smov [#allocation8]  }
  0x2d   :  { %45 = dma.vmem_to_smem %s43_s30, 16, %s1050_s13, [#allocation5]  }
  0x2e   :  { %1038 = dma.done.wait [#allocation3], 256  }
  0x2f   :  { %1039 = vsyncadd [#allocation3], 4294967040 }
  0x30   :  { %1040 = dma.done.wait [#allocation7], 256  }
  0x31   :  { %1041 = vsyncadd [#allocation7], 4294967040 }
  0x32   :  { %1042 = dma.done.wait [#allocation5], 16  }
  0x33   :  { %1043 = vsyncadd [#allocation5], 4294967280 }
  0x34   :  { %55 = sfence }
  0x35   :  { %v1102_v0 = vld [vmem:[#allocation2] sm:$0xff]  ;;  %v1104_v1 = vld [vmem:[#allocation2 + $0x8] sm:$0xff]  ;;  %vm84_vm0 = vcmask 130048   ;;  %s1051_s1 = smov 16   ;;  %v116_v16 = vlaneseq  ;;  %v1052_v20 = vmov 0.0   ;;  %s1053_s14 = smov 112  }
  0x36   :  { %v114_v2 = vmul.f32 %v1102_v0, %v1102_v0  ;;  %v115_v3 = vmul.f32 %v1104_v1, %v1104_v1  ;;  %s112_s16 = sld [smem:[#allocation8]]  ;;  %s838_s21 = sld [smem:[#allocation8 + $0x1]] }
  0x37   :  { %v117_v17 = vshrl.u32 %v116_v16, 7  ;;  %v120_v19 = vand.u32 127, %v116_v16  ;;  %v58_v16 = vld [vmem:[#allocation6] sm:$0xff]  ;;  %s1028_s27 = scalar_lea.hbm %s1163_s3, 16 }
  0x38   :  { %v127_v4 = vmul.f32 0.03125, %v114_v2  ;;  %v128_v5 = vmul.f32 0.03125, %v115_v3  ;;  %p1029_p7 = scmp.ne.s32.totalorder %s1163_s3, %s1028_s27  ;;  %p1032_p8 = scmp.lt.u32.totalorder %s1028_s27, %s1163_s3 }
  0x39   :  { %v118_v18 = vadd.s32 8, %v117_v17  ;;  %vm121_vm2 = vcmp.eq.s32.totalorder %v117_v17, %v120_v19  ;;  %v59_v17 = vld [vmem:[#allocation6 + $0x8] sm:$0xff] }
  0x3a   :  { %v916_v6 = vpack.c.bf16 %v128_v5, %v127_v4  ;;  %871 = vmatprep.mubr.msk.f32.mxu0 %vm84_vm0, %v127_v4  ;;  %v1118_v22 = vsel %vm121_vm2, 1.0, %v1052_v20  ;;  %v312_v24 = vmul.f32 0.008333334, %v128_v5  ;;  %v311_v26 = vmul.f32 0.008333334, %v127_v4  ;;  %p1034_p9 = pnand %p1032_p8, %p1029_p7 }
  0x3b   :  { %vm122_vm1 = vcmp.eq.s32.totalorder %v118_v18, %v120_v19  ;;  %v309_v25 = vmul.f32 0.041666668, %v1118_v22  ;;  %v299_v34 = vadd.f32 %v1118_v22, %v127_v4 }
  0x3c   :  { %917 = vmatprep.subr.bf16.mxu0 %v916_v6  ;;  %v1116_v21 = vsel %vm122_vm1, 1.0, %v1052_v20  ;;  %v60_v20 = vsub.f32 0.0, %v58_v16 }
  0x3d   :  { %919 = vmatpush3.bf16.msra.mxu0 %v916_v6  ;;  %v310_v23 = vmul.f32 0.041666668, %v1116_v21  ;;  %v300_v30 = vadd.f32 %v1116_v21, %v128_v5  ;;  %v313_v32 = vadd.f32 %v311_v26, %v309_v25  ;;  %v70_v26 = vsub.f32 1.0, %v58_v16 }
  0x3f   :  { %v314_v29 = vadd.f32 %v312_v24, %v310_v23  ;;  %v61_v24 = vsub.f32 0.0, %v59_v17 }
  0x40   :  { %872 = vmatmul.mubr.msk.f32.vlgmr.msra.gmra.mrb[0].mxu0 %vm84_vm0, %v128_v5 }
 0x113   :  { %v873_v7 = vpop.f32.mrb[0].mxu0 }
 0x114   :  { %v201_v8 = vpop.f32.mrb[1].mxu0  ;;  %v302_v27 = vmul.f32 0.5, %v873_v7  ;;  %v316_v28 = vmul.f32 0.0013888889, %v873_v7 }
 0x115   :  { %878 = vmatprep.mubr.msk.f32.mxu1 %vm84_vm0, %v201_v8  ;;  %v959_v9 = vpack.i.bf16 %v873_v7, %v201_v8  ;;  %v315_v31 = vmul.f32 0.0013888889, %v201_v8  ;;  %v301_v33 = vmul.f32 0.5, %v201_v8 }
 0x116   :  { %v318_v38 = vadd.f32 %v316_v28, %v314_v29  ;;  %v304_v40 = vadd.f32 %v302_v27, %v300_v30  ;;  %v71_v28 = vsub.f32 1.0, %v59_v17 }
 0x117   :  { %960 = vrot.lane.b32.xlu0 %v959_v9, %s1051_s1  ;;  %v317_v42 = vadd.f32 %v315_v31, %v313_v32  ;;  %v303_v46 = vadd.f32 %v301_v33, %v299_v34 }
 0x189   :  { %v961_v10 = vpop.permute.xlu0 %960 }
 0x18a   :  { %v963_v11 = vunpack.i.h.bf16 %v961_v10  ;;  %v962_v12 = vunpack.i.l.bf16 %v961_v10  ;;  %v62_v10 = vadd.f32 1e-08, %v1102_v0 }
 0x18c   :  { %v218_v13 = vsel %vm84_vm0, %v127_v4, %v962_v12  ;;  %v219_v14 = vsel %vm84_vm0, %v128_v5, %v963_v11  ;;  %v63_v11 = vadd.f32 1e-08, %v1104_v1  ;;  %964 = vlog2.f32 %v62_v10 }
 0x18d   :  { %v920_v15 = vpack.c.bf16 %v219_v14, %v218_v13  ;;  %v72_v12 = vsub.f32 1.0, %v1102_v0  ;;  %v73_v13 = vsub.f32 1.0, %v1104_v1 }
 0x18e   :  { %966 = vlog2.f32 %v63_v11 }
 0x18f   :  { %921 = vmatprep.subr.bf16.mxu1 %v920_v15  ;;  %v74_v14 = vadd.f32 1e-08, %v72_v12 }
 0x190   :  { %923 = vmatpush3.bf16.msra.mxu1 %v920_v15  ;;  %v75_v15 = vadd.f32 1e-08, %v73_v13 }
 0x191   :  { %968 = vlog2.f32 %v74_v14 }
 0x192   :  { %970 = vlog2.f32 %v75_v15 }
 0x193   :  { %879 = vmatmul.mubr.msk.f32.vlgmr.msra.gmra.mrb[0].mxu1 %vm84_vm0, %v873_v7 }
 0x196   :  { %v965_v18 = vpop.eup %964 }
 0x197   :  { %v65_v23 = vmul.f32 0.6931472, %v965_v18 }
 0x198   :  { %v967_v19 = vpop.eup %966 }
 0x199   :  { %v67_v25 = vmul.f32 0.6931472, %v967_v19  ;;  %v68_v30 = vmul.f32 %v65_v23, %v60_v20 }
 0x19b   :  { %v969_v27 = vpop.eup %968  ;;  %v69_v32 = vmul.f32 %v67_v25, %v61_v24 }
 0x19c   :  { %v971_v29 = vpop.eup %970  ;;  %v77_v31 = vmul.f32 0.6931472, %v969_v27 }
 0x19d   :  { %v79_v33 = vmul.f32 0.6931472, %v971_v29 }
 0x19e   :  { %v80_v34 = vmul.f32 %v77_v31, %v70_v26 }
 0x266   :  { %v880_v35 = vpop.f32.mrb[0].mxu1 }
 0x267   :  { %v290_v36 = vpop.f32.mrb[1].mxu1  ;;  %v324_v37 = vmul.f32 2.4801588e-05, %v880_v35  ;;  %v320_v39 = vmul.f32 0.0001984127, %v880_v35 }
 0x268   :  { %v323_v41 = vmul.f32 2.4801588e-05, %v290_v36  ;;  %v319_v43 = vmul.f32 0.0001984127, %v290_v36  ;;  %v306_v44 = vmul.f32 0.16666667, %v880_v35 }
 0x269   :  { %329 = vrot.lane.b32.xlu1 %v324_v37, %s1053_s14  ;;  %v322_v45 = vadd.f32 %v320_v39, %v318_v38  ;;  %v305_v47 = vmul.f32 0.16666667, %v290_v36  ;;  %v99_v37 = vand.u32 2147483647, %v1104_v1  ;;  %v82_v38 = vsub.f32 %v68_v30, %v80_v34 }
 0x26a   :  { %327 = vrot.lane.b32.xlu0 %v323_v41, %s1053_s14  ;;  %v321_v48 = vadd.f32 %v319_v43, %v317_v42  ;;  %v308_v49 = vadd.f32 %v306_v44, %v304_v40 }
 0x26b   :  { %v307_v50 = vadd.f32 %v305_v47, %v303_v46  ;;  %v85_v40 = vsel %vm84_vm0, %v82_v38, 0.0  ;;  %v101_v43 = vsel %vm84_vm0, %v99_v37, 0.0 }
 0x26d   :  { %337 = vrot.lane.b32.xlu1 %v290_v36, %s1053_s14  ;;  %v98_v36 = vand.u32 2147483647, %v1102_v0 }
 0x26e   :  { %339 = vrot.lane.b32.xlu0 %v880_v35, %s1053_s14  ;;  %v81_v35 = vmul.f32 %v79_v33, %v71_v28 }
 0x26f   :  { %v100_v42 = vsel %vm84_vm0, %v98_v36, 0.0 }
 0x270   :  { %v83_v39 = vsub.f32 %v69_v32, %v81_v35 }
 0x272   :  { %v86_v41 = vsel %vm84_vm0, %v83_v39, 0.0 }
 0x273   :  { %v87_v44 = vadd.f32 %v86_v41, %v85_v40 }
 0x28d   :  { %88 = vadd.xlane.f32.xlu0 %v87_v44 }
 0x2db   :  { %v330_v51 = vpop.permute.xlu1 %329 }
 0x2dc   :  { %v334_v52 = vadd.f32 %v330_v51, %v322_v45  ;;  %v328_v53 = vpop.permute.xlu0 %327  ;;  %v102_v45 = vadd.f32 %v101_v43, %v100_v42 }
 0x2dd   :  { %v333_v54 = vadd.f32 %v328_v53, %v321_v48 }
 0x2de   :  { %103 = vadd.xlane.f32.xlu0 %v102_v45 }
 0x2df   :  { %v924_v55 = vpack.c.bf16 %v334_v52, %v333_v54  ;;  %v338_v56 = vpop.permute.xlu1 %337 }
 0x2e0   :  { %885 = vmatprep.mubr.msk.f32.mxu0 %vm84_vm0, %v338_v56  ;;  %v340_v57 = vpop.permute.xlu0 %339 }
 0x2e1   :  { %925 = vmatprep.subr.bf16.mxu0 %v924_v55 }
 0x2e2   :  { %927 = vmatpush3.bf16.msra.mxu0 %v924_v55 }
 0x2e5   :  { %886 = vmatmul.mubr.msk.f32.vlgmr.msra.gmra.mrb[2].mxu0 %vm84_vm0, %v340_v57 }
 0x31a   :  { %v89_v0 = vpop.xlane.xlu0 %88 }
 0x31b   :  { %v90_v1 = vrot.slane %v89_v0, 4 }
 0x31d   :  { %v91_v48 = vadd.f32 %v90_v1, %v89_v0 }
 0x3b8   :  { %v887_v58 = vpop.f32.mrb[2].mxu0 }
 0x3b9   :  { %v421_v59 = vadd.f32 %v887_v58, %v308_v49  ;;  %v411_v60 = vpop.f32.mrb[3].mxu0  ;;  %v104_v49 = vpop.xlane.xlu0 %103 }
 0x3ba   :  { %v420_v61 = vadd.f32 %v411_v60, %v307_v50  ;;  %v92_v50 = vrot.slane %v91_v48, 2  ;;  %v105_v51 = vrot.slane %v104_v49, 4 }
 0x3bc   :  { %v928_v62 = vpack.c.bf16 %v421_v59, %v420_v61  ;;  %892 = vmatprep.mubr.msk.f32.mxu1 %vm84_vm0, %v420_v61  ;;  %v106_v52 = vadd.f32 %v105_v51, %v104_v49  ;;  %v93_v53 = vadd.f32 %v92_v50, %v91_v48 }
 0x3be   :  { %929 = vmatprep.subr.bf16.mxu1 %v928_v62  ;;  %v107_v54 = vrot.slane %v106_v52, 2  ;;  %v94_v55 = vrot.slane %v93_v53, 1 }
 0x3bf   :  { %931 = vmatpush3.bf16.msra.mxu1 %v928_v62 }
 0x3c0   :  { %v95_v56 = vadd.f32 %v94_v55, %v93_v53  ;;  %v108_v57 = vadd.f32 %v107_v54, %v106_v52 }
 0x3c2   :  { %893 = vmatmul.mubr.msk.f32.vlgmr.msra.gmra.mrb[2].mxu1 %vm84_vm0, %v421_v59  ;;  %944 = vpush %v95_v56  ;;  %v109_v58 = vrot.slane %v108_v57, 1 }
 0x3c4   :  { %v110_v59 = vadd.f32 %v109_v58, %v108_v57 }
 0x3c6   :  { %946 = vpush %v110_v59 }
 0x3f3   :  { %s945_s15 = spop %944 }
 0x3f4   :  { %s97_s17 = smul.f32 0.00390625, %s945_s15 }
 0x3f6   :  { %801 = sst [smem:[#allocation9 + $0x1]] %s97_s17 }
 0x3f7   :  { %s947_s18 = spop %946 }
 0x3f8   :  { %s113_s19 = smul.f32 %s947_s18, %s112_s16 }
 0x3fa   :  { %s796_s20 = sadd.f32 %s113_s19, %s97_s17 }
 0x3fb   :  { %803 = sst [smem:[#allocation9 + $0x2]] %s113_s19 }
 0x495   :  { %v894_v63 = vpop.f32.mrb[2].mxu1 }
 0x496   :  { %v494_v2 = vpop.f32.mrb[3].mxu1 }
 0x497   :  { %v932_v3 = vpack.c.bf16 %v894_v63, %v494_v2  ;;  %899 = vmatprep.mubr.msk.f32.mxu0 %vm84_vm0, %v494_v2 }
 0x499   :  { %933 = vmatprep.subr.bf16.mxu0 %v932_v3 }
 0x49a   :  { %935 = vmatpush3.bf16.msra.mxu0 %v932_v3 }
 0x49d   :  { %900 = vmatmul.mubr.msk.f32.vlgmr.msra.gmra.mrb[4].mxu0 %vm84_vm0, %v894_v63 }
 0x570   :  { %v901_v4 = vpop.f32.mrb[4].mxu0 }
 0x571   :  { %v575_v5 = vpop.f32.mrb[5].mxu0 }
 0x572   :  { %v936_v6 = vpack.c.bf16 %v901_v4, %v575_v5  ;;  %906 = vmatprep.mubr.msk.f32.mxu1 %vm84_vm0, %v575_v5 }
 0x574   :  { %937 = vmatprep.subr.bf16.mxu1 %v936_v6 }
 0x575   :  { %939 = vmatpush3.bf16.msra.mxu1 %v936_v6 }
 0x578   :  { %907 = vmatmul.mubr.msk.f32.vlgmr.msra.gmra.mrb[4].mxu1 %vm84_vm0, %v901_v4 }
 0x64b   :  { %v908_v7 = vpop.f32.mrb[4].mxu1 }
 0x64c   :  { %v656_v8 = vpop.f32.mrb[5].mxu1 }
 0x64d   :  { %v940_v9 = vpack.c.bf16 %v908_v7, %v656_v8  ;;  %913 = vmatprep.mubr.msk.f32.mxu0 %vm84_vm0, %v656_v8 }
 0x64f   :  { %941 = vmatprep.subr.bf16.mxu0 %v940_v9 }
 0x650   :  { %943 = vmatpush3.bf16.msra.mxu0 %v940_v9 }
 0x653   :  { %914 = vmatmul.mubr.msk.f32.vlgmr.msra.gmra.mrb[6].mxu0 %vm84_vm0, %v908_v7 }
 0x726   :  { %v915_v46 = vpop.f32.mrb[6].mxu0 }
 0x727   :  { %v737_v47 = vpop.f32.mrb[7].mxu0 }
 0x728   :  { %746 = vxpose.xlu1.b32.start [1/2] (short) (narrow) %v737_v47, 16 }
 0x72c   :  { %747 = vxpose.xlu1.b32.end [2/2] (short) (narrow) %v915_v46, 16 }
 0x7a8   :  { %v762_v60 = vpop.trf.xlu1 }
 0x7a9   :  { %v778_v61 = vmul.f32 %v762_v60, %v737_v47 }
 0x7ab   :  { %v780_v63 = vsub.f32 %v778_v61, %v1118_v22 }
 0x7ac   :  { %v763_v62 = vpop.trf.xlu1 }
 0x7ad   :  { %v779_v2 = vmul.f32 %v915_v46, %v763_v62  ;;  %v782_v4 = vsel %vm84_vm0, %v780_v63, 0.0 }
 0x7af   :  { %v781_v3 = vsub.f32 %v779_v2, %v1116_v21 }
 0x7b1   :  { %v783_v5 = vsel %vm84_vm0, %v781_v3, 0.0 }
 0x7b2   :  { %v784_v6 = vadd.f32 %v783_v5, %v782_v4 }
 0x7b4   :  { %785 = vadd.xlane.f32.xlu0 %v784_v6 }
 0x841   :  { %v786_v7 = vpop.xlane.xlu0 %785 }
 0x842   :  { %v787_v8 = vrot.slane %v786_v7, 4 }
 0x844   :  { %v788_v22 = vadd.f32 %v787_v8, %v786_v7 }
 0x846   :  { %v789_v9 = vrot.slane %v788_v22, 2 }
 0x848   :  { %v790_v10 = vadd.f32 %v789_v9, %v788_v22 }
 0x84a   :  { %v791_v21 = vrot.slane %v790_v10, 1 }
 0x84c   :  { %v792_v11 = vadd.f32 %v791_v21, %v790_v10 }
 0x84e   :  { %948 = vpush %v792_v11 }
 0x87f   :  { %s949_s22 = spop %948 }
 0x880   :  { %s795_s23 = smul.f32 %s949_s22, %s838_s21 }
 0x882   :  { %s797_s24 = sadd.f32 %s796_s20, %s795_s23 }
 0x883   :  { %805 = sst [smem:[#allocation9 + $0x3]] %s795_s23 }
 0x884   :  { %799 = sst [smem:[#allocation9]] %s797_s24 }
 0x885   :  { %1037 = shalt.err (!%p1034_p9)
}
 0x886   :  { %s1054_s5 = smov [#allocation9]  }
 0x887   :  { %813 = dma.smem_to_hbm %s1054_s5, 16, %s1163_s3, [#allocation4]  }
 0x888   :  { %1044 = dma.done.wait [#allocation4], 16  }
 0x889   :  { %1045 = vsyncadd [#allocation4], 4294967280 }
 0x88a   :  { %817 = sfence }
 0x88b   :  { %818 = vsyncpa [#allocation3], 1 }
 0x88c   :  { %819 = vsyncpa [#allocation7], 1 }
 0x88d   :  { %820 = vsyncpa [#allocation4], 1 }
 0x88e   :  { %821 = vsyncpa [#allocation5], 1 }

</bundles_post_ra>
